<compile_context>
chip_gen: v7x
topology: tpu7x:2x2x1
jax: 0.10.0
libtpu: 0.0.40
codegen_flags: <defaults>
</compile_context>

<pallas_src>
import functools

import jax
import jax.numpy as jnp
from jax.experimental import pallas as pl
from jax.experimental.pallas import tpu as pltpu


# ----------------------------------------------------------------------------
# per-generation tuning knobs (detected once; conservative fallback)
# ----------------------------------------------------------------------------

def _tpu_tuning():
    kind = ""
    try:
        kind = jax.devices()[0].device_kind.lower()
    except Exception:
        pass
    if "v2" in kind or "v3" in kind:
        # 16 MiB VMEM class: small tiles, leave the scoped limit alone.
        return dict(vmem=None, tm=256, tn=256, tk=512, ln_tm=512)
    if "v7" in kind:
        # 64 MiB VMEM / TC, 3.2 TB/s HBM: smaller tiles, capped scoped VMEM.
        return dict(vmem=48 * 1024 * 1024, tm=256, tn=256, tk=512, ln_tm=512)
    if any(t in kind for t in ("v4", "v5", "v6")):
        # 128 MiB VMEM, lower HBM BW: large output-stationary tiles.
        return dict(vmem=96 * 1024 * 1024, tm=512, tn=512, tk=512, ln_tm=1024)
    # Unknown backend: conservative defaults, do not touch the VMEM limit.
    return dict(vmem=None, tm=256, tn=256, tk=512, ln_tm=512)


_TUNE = _tpu_tuning()


def _mosaic_params(dims):
    kw = dict(dimension_semantics=dims)
    if _TUNE["vmem"] is not None:
        kw["vmem_limit_bytes"] = _TUNE["vmem"]
    return pltpu.CompilerParams(**kw)


def _pick_tile(dim, target, aligns):
    """Largest multiple of an alignment (tried coarsest-first) that divides
    `dim` and is <= target; falls back to the full dimension."""
    if dim <= target:
        return dim
    for align in aligns:
        t = (target // align) * align
        while t >= align:
            if dim % t == 0:
                return t
            t -= align
    return dim


def _full_spec(shape):
    """BlockSpec covering the whole (tiny) array — only used for the head kernel."""
    return pl.BlockSpec(shape, lambda *_: (0,) * len(shape))


# ----------------------------------------------------------------------------
# tiled dense GEMM (optional GELU epilogue)
# ----------------------------------------------------------------------------

def _dense_kernel(x_ref, w_ref, b_ref, o_ref, acc_ref, *, activation):
    k = pl.program_id(2)

    @pl.when(k == 0)
    def _():
        acc_ref[...] = jnp.zeros_like(acc_ref)

    acc_ref[...] += jnp.dot(x_ref[...], w_ref[...],
                            preferred_element_type=jnp.float32)

    @pl.when(k == pl.num_programs(2) - 1)
    def _():
        y = acc_ref[...] + b_ref[...]
        if activation == "gelu":
            # TODO(synk): HF BERT default is erf-GELU; tanh-approx GELU used here.
            y = jax.nn.gelu(y, approximate=True)
        o_ref[...] = y.astype(o_ref.dtype)


def dense(x, w, b, activation="none", out_dtype=jnp.bfloat16):
    M, K = x.shape
    N = w.shape[1]
    tm = _pick_tile(M, _TUNE["tm"], (256, 8))
    tn = _pick_tile(N, _TUNE["tn"], (256, 128))
    tk = _pick_tile(K, _TUNE["tk"], (256, 128))   # 256-aligned feeds 256x256 MXU
    grid = (M // tm, N // tn, K // tk)
    return pl.pallas_call(
        functools.partial(_dense_kernel, activation=activation),
        out_shape=jax.ShapeDtypeStruct((M, N), out_dtype),
        grid=grid,
        in_specs=[
            pl.BlockSpec((tm, tk), lambda i, j, k: (i, k)),
            pl.BlockSpec((tk, tn), lambda i, j, k: (k, j)),
            pl.BlockSpec((1, tn), lambda i, j, k: (0, j)),
        ],
        out_specs=pl.BlockSpec((tm, tn), lambda i, j, k: (i, j)),
        scratch_shapes=[pltpu.VMEM((tm, tn), jnp.float32)],
        compiler_params=_mosaic_params(("parallel", "parallel", "arbitrary")),
    )(x, w, b.reshape(1, N).astype(jnp.float32))


# ----------------------------------------------------------------------------
# tiled dense GEMM with fused bias + residual + LayerNorm epilogue
# ----------------------------------------------------------------------------

def _dense_add_ln_kernel(x_ref, w_ref, b_ref, res_ref, g_ref, bb_ref, o_ref,
                         acc_ref, *, eps):
    k = pl.program_id(1)

    @pl.when(k == 0)
    def _():
        acc_ref[...] = jnp.zeros_like(acc_ref)

    acc_ref[...] += jnp.dot(x_ref[...], w_ref[...],
                            preferred_element_type=jnp.float32)

    @pl.when(k == pl.num_programs(1) - 1)
    def _():
        h = acc_ref[...] + b_ref[...] + res_ref[...].astype(jnp.float32)
        mu = jnp.mean(h, axis=-1, keepdims=True)
        var = jnp.mean(jnp.square(h - mu), axis=-1, keepdims=True)
        out = (h - mu) * jax.lax.rsqrt(var + eps) * g_ref[...] + bb_ref[...]
        o_ref[...] = out.astype(o_ref.dtype)


def dense_add_layernorm(x, w, b, res, gamma, beta, eps=1e-12,
                        out_dtype=jnp.bfloat16):
    """LayerNorm(x @ w + b + res) over the last axis; N kept un-tiled."""
    M, K = x.shape
    N = w.shape[1]
    tm = _pick_tile(M, _TUNE["ln_tm"], (256, 8))   # large tm -> fewer weight re-reads
    tk = _pick_tile(K, _TUNE["tk"], (256, 128))
    grid = (M // tm, K // tk)
    return pl.pallas_call(
        functools.partial(_dense_add_ln_kernel, eps=eps),
        out_shape=jax.ShapeDtypeStruct((M, N), out_dtype),
        grid=grid,
        in_specs=[
            pl.BlockSpec((tm, tk), lambda i, k: (i, k)),
            pl.BlockSpec((tk, N), lambda i, k: (k, 0)),
            pl.BlockSpec((1, N), lambda i, k: (0, 0)),
            pl.BlockSpec((tm, N), lambda i, k: (i, 0)),
            pl.BlockSpec((1, N), lambda i, k: (0, 0)),
            pl.BlockSpec((1, N), lambda i, k: (0, 0)),
        ],
        out_specs=pl.BlockSpec((tm, N), lambda i, k: (i, 0)),
        scratch_shapes=[pltpu.VMEM((tm, N), jnp.float32)],
        compiler_params=_mosaic_params(("parallel", "arbitrary")),
    )(x, w, b.reshape(1, N).astype(jnp.float32), res,
      gamma.reshape(1, N).astype(jnp.float32),
      beta.reshape(1, N).astype(jnp.float32))


# ----------------------------------------------------------------------------
# fused embedding-sum + LayerNorm (word + type + position, then LN)
# ----------------------------------------------------------------------------

def _emb_ln_kernel(w_ref, t_ref, p_ref, g_ref, b_ref, o_ref, *, eps):
    h = (w_ref[0].astype(jnp.float32) + t_ref[0].astype(jnp.float32)
         + p_ref[...].astype(jnp.float32))
    mu = jnp.mean(h, axis=-1, keepdims=True)
    var = jnp.mean(jnp.square(h - mu), axis=-1, keepdims=True)
    out = (h - mu) * jax.lax.rsqrt(var + eps) * g_ref[...] + b_ref[...]
    o_ref[0, :, :] = out.astype(o_ref.dtype)


def emb_layernorm(word, typ, pos, gamma, beta, eps=1e-12,
                  out_dtype=jnp.bfloat16):
    B, S, H = word.shape
    bsh_spec = pl.BlockSpec((1, S, H), lambda b: (b, 0, 0))
    return pl.pallas_call(
        functools.partial(_emb_ln_kernel, eps=eps),
        out_shape=jax.ShapeDtypeStruct((B, S, H), out_dtype),
        grid=(B,),
        in_specs=[bsh_spec, bsh_spec,
                  pl.BlockSpec((S, H), lambda b: (0, 0)),
                  pl.BlockSpec((1, H), lambda b: (0, 0)),
                  pl.BlockSpec((1, H), lambda b: (0, 0))],
        out_specs=bsh_spec,
        compiler_params=_mosaic_params(("parallel",)),
    )(word, typ, pos, gamma.reshape(1, H).astype(jnp.float32),
      beta.reshape(1, H).astype(jnp.float32))


# ----------------------------------------------------------------------------
# multi-head self-attention on the fused (B, S, 3H) QKV layout
# ----------------------------------------------------------------------------

def _attn_kernel(qkv_ref, m_ref, o_ref, acc_ref, *, n_heads, head_dim, hidden,
                 scale):
    qkv = qkv_ref[0]                     # (S, 3H) bf16
    mask = m_ref[0]                      # (1, S) f32 additive mask
    for h in range(n_heads):
        q_sl = slice(h * head_dim, (h + 1) * head_dim)
        k_sl = slice(hidden + h * head_dim, hidden + (h + 1) * head_dim)
        v_sl = slice(2 * hidden + h * head_dim, 2 * hidden + (h + 1) * head_dim)
        qh = qkv[:, q_sl]
        kh = qkv[:, k_sl]
        vh = qkv[:, v_sl]
        # q @ k^T contracting Dh of both operands -> no materialized transpose.
        s = jax.lax.dot_general(
            qh, kh, (((1,), (1,)), ((), ())),
            preferred_element_type=jnp.float32) * scale           # (S, S) f32
        s = s + mask
        s = s - jnp.max(s, axis=-1, keepdims=True)
        p = jnp.exp(s)
        p = p * pl.reciprocal(jnp.sum(p, axis=-1, keepdims=True), approx=True)
        ctx = jnp.dot(p.astype(vh.dtype), vh,
                      preferred_element_type=jnp.float32)          # (S, Dh)
        acc_ref[:, q_sl] = ctx           # static lane slice into f32 scratch
    # single full-width (lane-dense) store per batch element
    o_ref[0, :, :] = acc_ref[...].astype(o_ref.dtype)


def multihead_attention(qkv, add_mask, *, n_heads, hidden):
    """qkv: (B, S, 3H) bf16 fused projections; add_mask: (B, 1, S) f32."""
    B, S, H3 = qkv.shape
    H = hidden
    Dh = H // n_heads
    scale = 1.0 / (Dh ** 0.5)
    return pl.pallas_call(
        functools.partial(_attn_kernel, n_heads=n_heads, head_dim=Dh,
                          hidden=H, scale=scale),
        out_shape=jax.ShapeDtypeStruct((B, S, H), jnp.bfloat16),
        grid=(B,),
        in_specs=[pl.BlockSpec((1, S, H3), lambda b: (b, 0, 0)),
                  pl.BlockSpec((1, 1, S), lambda b: (b, 0, 0))],
        out_specs=pl.BlockSpec((1, S, H), lambda b: (b, 0, 0)),
        scratch_shapes=[pltpu.VMEM((S, H), jnp.float32)],
        compiler_params=_mosaic_params(("parallel",)),
    )(qkv, add_mask)


# ----------------------------------------------------------------------------
# fused pooler + classifier + softmax (tiny shapes -> single kernel, f32)
# ----------------------------------------------------------------------------

def _head_kernel(cls_ref, pw_ref, pb_ref, cw_ref, cb_ref, o_ref):
    pooled = jnp.tanh(
        jnp.dot(cls_ref[...], pw_ref[...], preferred_element_type=jnp.float32)
        + pb_ref[...])                                              # (B, H) f32
    logits = jnp.dot(pooled, cw_ref[...],
                     preferred_element_type=jnp.float32) + cb_ref[...]
    logits = logits - jnp.max(logits, axis=-1, keepdims=True)
    e = jnp.exp(logits)
    o_ref[...] = (e / jnp.sum(e, axis=-1, keepdims=True)).astype(o_ref.dtype)


def classifier_head(cls_tok, pooler_w, pooler_b, cls_w, cls_b):
    B, H = cls_tok.shape
    L = cls_w.shape[1]
    return pl.pallas_call(
        _head_kernel,
        out_shape=jax.ShapeDtypeStruct((B, L), jnp.float32),
        in_specs=[_full_spec((B, H)), _full_spec((H, H)), _full_spec((1, H)),
                  _full_spec((H, L)), _full_spec((1, L))],
        out_specs=_full_spec((B, L)),
    )(cls_tok, pooler_w, pooler_b.reshape(1, H).astype(jnp.float32),
      cls_w.astype(jnp.float32), cls_b.reshape(1, L).astype(jnp.float32))


# ----------------------------------------------------------------------------
# Parameter construction (deterministic, synthetic). Matmul/emb weights bf16.
# ----------------------------------------------------------------------------

def make_params(key, *, vocab_size, max_pos, type_vocab, hidden, n_heads,
                intermediate, n_layers, num_labels):
    keys = iter(jax.random.split(key, 16 * n_layers + 16))

    def w(shape, std=0.02, dtype=jnp.bfloat16):
        return (jax.random.normal(next(keys), shape, jnp.float32) * std).astype(dtype)

    params = {
        "word_emb": w((vocab_size, hidden)),
        "pos_emb": w((max_pos, hidden)),
        "type_emb": w((type_vocab, hidden)),
        "emb_ln_g": jnp.ones((hidden,), jnp.float32),
        "emb_ln_b": jnp.zeros((hidden,), jnp.float32),
        "layers": [],
        "pooler_w": w((hidden, hidden)),
        "pooler_b": jnp.zeros((hidden,), jnp.float32),
        "cls_w": w((hidden, num_labels), dtype=jnp.float32),
        "cls_b": jnp.zeros((num_labels,), jnp.float32),
    }
    for _ in range(n_layers):
        q_w, k_w, v_w = (w((hidden, hidden)), w((hidden, hidden)),
                         w((hidden, hidden)))
        params["layers"].append({
            "qkv_w": jnp.concatenate([q_w, k_w, v_w], axis=1),     # (H, 3H) bf16
            "qkv_b": jnp.zeros((3 * hidden,), jnp.float32),
            "o_w": w((hidden, hidden)),
            "o_b": jnp.zeros((hidden,), jnp.float32),
            "attn_ln_g": jnp.ones((hidden,), jnp.float32),
            "attn_ln_b": jnp.zeros((hidden,), jnp.float32),
            "ffn_w1": w((hidden, intermediate)),
            "ffn_b1": jnp.zeros((intermediate,), jnp.float32),
            "ffn_w2": w((intermediate, hidden)),
            "ffn_b2": jnp.zeros((hidden,), jnp.float32),
            "out_ln_g": jnp.ones((hidden,), jnp.float32),
            "out_ln_b": jnp.zeros((hidden,), jnp.float32),
        })
    return params


# ----------------------------------------------------------------------------
# BERT text classifier forward (inference; dropout is identity)
# ----------------------------------------------------------------------------

def bert_text_classifier(params, input_ids, attention_mask, token_type_ids,
                         *, n_heads):
    B, S = input_ids.shape
    H = params["word_emb"].shape[1]

    # ---- embeddings: gathers are XLA glue; sum + LN fused in one kernel ----
    word = jnp.take(params["word_emb"], input_ids, axis=0)          # (B,S,H) bf16
    typ = jnp.take(params["type_emb"], token_type_ids, axis=0)      # (B,S,H) bf16
    pos = params["pos_emb"][:S]                                      # (S,H)  bf16
    x = emb_layernorm(word, typ, pos, params["emb_ln_g"], params["emb_ln_b"])
    x2d = x.reshape(B * S, H)                                        # bf16

    # additive attention mask (B, 1, S), kept in f32 so -1e4 survives bf16 scores
    add_mask = ((1.0 - attention_mask.astype(jnp.float32)) * -10000.0)[:, None, :]

    for lp in params["layers"]:
        # ---- self attention: fused QKV projection fed directly to attention ----
        qkv = dense(x2d, lp["qkv_w"], lp["qkv_b"]).reshape(B, S, 3 * H)
        ctx = multihead_attention(qkv, add_mask, n_heads=n_heads, hidden=H)

        # output projection fused with bias + residual + LayerNorm
        x2d = dense_add_layernorm(ctx.reshape(B * S, H), lp["o_w"], lp["o_b"],
                                  x2d, lp["attn_ln_g"], lp["attn_ln_b"])

        # ---- feed-forward: GELU GEMM, second GEMM fused with residual + LN ----
        ffn = dense(x2d, lp["ffn_w1"], lp["ffn_b1"], activation="gelu")
        x2d = dense_add_layernorm(ffn, lp["ffn_w2"], lp["ffn_b2"],
                                  x2d, lp["out_ln_g"], lp["out_ln_b"])

    # ---- pooler(tanh) + classifier + softmax, fused, f32 ----
    cls_tok = x2d.reshape(B, S, H)[:, 0, :]                          # (B, H) bf16
    return classifier_head(cls_tok, params["pooler_w"], params["pooler_b"],
                           params["cls_w"], params["cls_b"])


# ----------------------------------------------------------------------------
# main
# ----------------------------------------------------------------------------

if __name__ == "__main__":
    B, S = 2, 8
    HIDDEN, N_HEADS, INTER = 32, 4, 64
    N_LAYERS, VOCAB, MAX_POS, TYPE_VOCAB, NUM_LABELS = 2, 100, 16, 2, 3

    key = jax.random.PRNGKey(0)
    k_par, k_ids, k_types = jax.random.split(key, 3)

    params = make_params(k_par, vocab_size=VOCAB, max_pos=MAX_POS,
                         type_vocab=TYPE_VOCAB, hidden=HIDDEN,
                         n_heads=N_HEADS, intermediate=INTER,
                         n_layers=N_LAYERS, num_labels=NUM_LABELS)

    input_ids = jax.random.randint(k_ids, (B, S), 0, VOCAB, dtype=jnp.int32)
    token_type_ids = jax.random.randint(k_types, (B, S), 0, TYPE_VOCAB,
                                        dtype=jnp.int32)
    attention_mask = jnp.ones((B, S), jnp.int32).at[1, 6:].set(0)  # pad tail of ex. 1

    probs = bert_text_classifier(params, input_ids, attention_mask,
                                 token_type_ids, n_heads=N_HEADS)
    probs = jax.block_until_ready(probs)

    assert probs.shape == (B, NUM_LABELS)
    assert bool(jnp.allclose(jnp.sum(probs, axis=1), 1.0, atol=1e-4))
    print("KERNEL_OK")
</pallas_src>

<mosaic_0001>
module attributes {stable_mosaic.version = 11 : i64} {
  func.func @_emb_ln_kernel(%arg0: i32, %arg1: memref<1x8x32xbf16, #tpu.memory_space<vmem>>, %arg2: memref<1x8x32xbf16, #tpu.memory_space<vmem>>, %arg3: memref<8x32xbf16, #tpu.memory_space<vmem>>, %arg4: memref<1x32xf32, #tpu.memory_space<vmem>>, %arg5: memref<1x32xf32, #tpu.memory_space<vmem>>, %arg6: memref<1x8x32xbf16, #tpu.memory_space<vmem>>) attributes {dimension_semantics = [#tpu.dimension_semantics<parallel>], iteration_bounds = array<i64: 2>, scalar_prefetch = 0 : i64, scratch_operands = 0 : i64, tpu.core_type = #tpu.core_type<tc>, window_params = [{transform_indices = @transform_0, window_bounds = array<i64: 1, 8, 32>}, {transform_indices = @transform_1, window_bounds = array<i64: 1, 8, 32>}, {pipeline_mode = #tpu.pipeline_mode<synchronous>, transform_indices = @transform_2, window_bounds = array<i64: 8, 32>}, {pipeline_mode = #tpu.pipeline_mode<synchronous>, transform_indices = @transform_3, window_bounds = array<i64: 1, 32>}, {pipeline_mode = #tpu.pipeline_mode<synchronous>, transform_indices = @transform_4, window_bounds = array<i64: 1, 32>}, {transform_indices = @transform_5, window_bounds = array<i64: 1, 8, 32>}]} {
    %c0 = arith.constant 0 : index
    %c0_0 = arith.constant 0 : index
    %c0_1 = arith.constant 0 : index
    %0 = vector.load %arg1[%c0, %c0_0, %c0_1] : memref<1x8x32xbf16, #tpu.memory_space<vmem>>, vector<1x8x32xbf16>
    %1 = vector.shape_cast %0 : vector<1x8x32xbf16> to vector<8x32xbf16>
    %2 = arith.extf %1 : vector<8x32xbf16> to vector<8x32xf32>
    %c0_2 = arith.constant 0 : index
    %c0_3 = arith.constant 0 : index
    %c0_4 = arith.constant 0 : index
    %3 = vector.load %arg2[%c0_2, %c0_3, %c0_4] : memref<1x8x32xbf16, #tpu.memory_space<vmem>>, vector<1x8x32xbf16>
    %4 = vector.shape_cast %3 : vector<1x8x32xbf16> to vector<8x32xbf16>
    %5 = arith.extf %4 : vector<8x32xbf16> to vector<8x32xf32>
    %6 = arith.addf %2, %5 : vector<8x32xf32>
    %c0_5 = arith.constant 0 : index
    %c0_6 = arith.constant 0 : index
    %7 = vector.load %arg3[%c0_5, %c0_6] : memref<8x32xbf16, #tpu.memory_space<vmem>>, vector<8x32xbf16>
    %8 = arith.extf %7 : vector<8x32xbf16> to vector<8x32xf32>
    %9 = arith.addf %6, %8 : vector<8x32xf32>
    %cst = arith.constant dense<0.000000e+00> : vector<8xf32>
    %10 = vector.multi_reduction <add>, %9, %cst [1] : vector<8x32xf32> to vector<8xf32>
    %11 = vector.shape_cast %10 : vector<8xf32> to vector<8x1xf32>
    %cst_7 = arith.constant 3.200000e+01 : f32
    %12 = vector.broadcast %cst_7 : f32 to vector<8x1xf32>
    %13 = arith.divf %11, %12 : vector<8x1xf32>
    %14 = vector.broadcast %13 : vector<8x1xf32> to vector<8x32xf32>
    %15 = arith.subf %9, %14 : vector<8x32xf32>
    %16 = arith.mulf %15, %15 : vector<8x32xf32>
    %cst_8 = arith.constant dense<0.000000e+00> : vector<8xf32>
    %17 = vector.multi_reduction <add>, %16, %cst_8 [1] : vector<8x32xf32> to vector<8xf32>
    %18 = vector.shape_cast %17 : vector<8xf32> to vector<8x1xf32>
    %cst_9 = arith.constant 3.200000e+01 : f32
    %19 = vector.broadcast %cst_9 : f32 to vector<8x1xf32>
    %20 = arith.divf %18, %19 : vector<8x1xf32>
    %21 = vector.broadcast %13 : vector<8x1xf32> to vector<8x32xf32>
    %22 = arith.subf %9, %21 : vector<8x32xf32>
    %cst_10 = arith.constant 9.99999996E-13 : f32
    %23 = vector.broadcast %cst_10 : f32 to vector<8x1xf32>
    %24 = arith.addf %20, %23 : vector<8x1xf32>
    %25 = math.rsqrt %24 : vector<8x1xf32>
    %26 = vector.broadcast %25 : vector<8x1xf32> to vector<8x32xf32>
    %27 = arith.mulf %22, %26 : vector<8x32xf32>
    %c0_11 = arith.constant 0 : index
    %c0_12 = arith.constant 0 : index
    %28 = vector.load %arg4[%c0_11, %c0_12] : memref<1x32xf32, #tpu.memory_space<vmem>>, vector<1x32xf32>
    %29 = vector.broadcast %28 : vector<1x32xf32> to vector<8x32xf32>
    %30 = arith.mulf %27, %29 : vector<8x32xf32>
    %c0_13 = arith.constant 0 : index
    %c0_14 = arith.constant 0 : index
    %31 = vector.load %arg5[%c0_13, %c0_14] : memref<1x32xf32, #tpu.memory_space<vmem>>, vector<1x32xf32>
    %32 = vector.broadcast %31 : vector<1x32xf32> to vector<8x32xf32>
    %33 = arith.addf %30, %32 : vector<8x32xf32>
    %34 = arith.truncf %33 : vector<8x32xf32> to vector<8x32xbf16>
    %c0_15 = arith.constant 0 : index
    %c0_16 = arith.constant 0 : index
    %c0_17 = arith.constant 0 : index
    %35 = vector.load %arg6[%c0_15, %c0_16, %c0_17] : memref<1x8x32xbf16, #tpu.memory_space<vmem>>, vector<1x8x32xbf16>
    %36 = vector.shape_cast %35 : vector<1x8x32xbf16> to vector<8x32xbf16>
    %37 = vector.shape_cast %34 : vector<8x32xbf16> to vector<1x8x32xbf16>
    tpu.vector_store %arg6[%c0_15, %c0_16, %c0_17], %37 {strides = array<i32>} : memref<1x8x32xbf16, #tpu.memory_space<vmem>>, vector<1x8x32xbf16>,
    return
  }
  func.func @transform_0(%arg0: i32) -> (i32, i32, i32) {
    %c0_i32 = arith.constant 0 : i32
    %c0_i32_0 = arith.constant 0 : i32
    %c0_i32_1 = arith.constant 0 : i32
    return %arg0, %c0_i32, %c0_i32_0 : i32, i32, i32
  }
  func.func @transform_1(%arg0: i32) -> (i32, i32, i32) {
    %c0_i32 = arith.constant 0 : i32
    %c0_i32_0 = arith.constant 0 : i32
    %c0_i32_1 = arith.constant 0 : i32
    return %arg0, %c0_i32, %c0_i32_0 : i32, i32, i32
  }
  func.func @transform_2(%arg0: i32) -> (i32, i32) {
    %c0_i32 = arith.constant 0 : i32
    %c0_i32_0 = arith.constant 0 : i32
    %c0_i32_1 = arith.constant 0 : i32
    return %c0_i32, %c0_i32_0 : i32, i32
  }
  func.func @transform_3(%arg0: i32) -> (i32, i32) {
    %c0_i32 = arith.constant 0 : i32
    %c0_i32_0 = arith.constant 0 : i32
    %c0_i32_1 = arith.constant 0 : i32
    return %c0_i32, %c0_i32_0 : i32, i32
  }
  func.func @transform_4(%arg0: i32) -> (i32, i32) {
    %c0_i32 = arith.constant 0 : i32
    %c0_i32_0 = arith.constant 0 : i32
    %c0_i32_1 = arith.constant 0 : i32
    return %c0_i32, %c0_i32_0 : i32, i32
  }
  func.func @transform_5(%arg0: i32) -> (i32, i32, i32) {
    %c0_i32 = arith.constant 0 : i32
    %c0_i32_0 = arith.constant 0 : i32
    %c0_i32_1 = arith.constant 0 : i32
    return %arg0, %c0_i32, %c0_i32_0 : i32, i32, i32
  }
}

</mosaic_0001>

<bundles_post_ra>
// kernel: tpu_custom_call.1
= control target key start
LH: loop header
LB: loop body
LE: loop exit
PB: predicated region body
PF: predicated region fallthrough
CT: control target
= control target key end

     0   :  { %10 = vsyncpa [#allocation3], 0  ;;  %s884_s0 = inlined_call_operand.hbm [shape: bf16[2,8,32], index: 0, kind: input, shape index: {}]   ;;  %s885_s1 = inlined_call_operand.hbm [shape: bf16[2,8,32], index: 1, kind: input, shape index: {}]   ;;  %s886_s2 = inlined_call_operand.vmem [shape: bf16[8,32], index: 2, kind: input, shape index: {}]   ;;  %s887_s3 = inlined_call_operand.vmem [shape: f32[1,32], index: 3, kind: input, shape index: {}]   ;;  %s888_s4 = inlined_call_operand.vmem [shape: f32[1,32], index: 4, kind: input, shape index: {}]   ;;  %s889_s5 = inlined_call_operand.hbm [shape: bf16[2,8,32], index: 5, kind: output, shape index: {}]  }
   0x1   :  { %12 = vsyncpa [#allocation3 + $0x1], 0 }
   0x2   :  { %13 = vsyncpa [#allocation6], 0 }
   0x3   :  { %15 = vsyncpa [#allocation6 + $0x1], 0 }
   0x4   :  { %16 = vsyncpa [#allocation4], 0 }
   0x5   :  { %18 = vsyncpa [#allocation4 + $0x1], 0  ;;  %s661_s18 = smov 0   ;;  %s663_s19 = smov 0  }
   0x6   :  { %s665_s20 = smov 0   ;;  %s667_s21 = smov 0  }
   0x7 LB: > { %s682_s22 = sadd.s32 4294967295, %s626_s21   ;;  %s426_s23 = sadd.s32 4294967294, %s626_s21   ;;  %s626_s21 = sphi %s667_s21, %s908_s21   ;;  %s622_s20 = sphi %s665_s20, %s907_s20   ;;  %s618_s19 = sphi %s663_s19, %s906_s19   ;;  %s614_s18 = sphi %s661_s18, %s905_s18  }
   0x8   : > { %s686_s24 = sadd.s32 1, %s626_s21   ;;  %s31_s25 = sadd.s32 1, %s622_s20 }
   0x9   : > { %s28_s26 = ssub.s32 %s626_s21, %s686_s24  ;;  %p38_p0 = scmp.ne.s32.totalorder %s622_s20, %s618_s19 }
   0xa   : > { %p29_p1 = scmp.eq.s32.totalorder %s28_s26, 0  ;;  %p39_p2 = scmp.eq.s32.totalorder %s626_s21, 0 }
   0xb   : > { %p44_p3 = scmp.ne.s32.totalorder %s618_s19, %s614_s18  ;;  %p45_p4 = scmp.eq.s32.totalorder %s682_s22, 0 }
   0xc   : > { %s698_s27 = scalar_select %p29_p1, %s622_s20, %s31_s25  }
   0xd   : > { %p700_p5 = por %p39_p2, %p38_p0  ;;  %p704_p6 = por %p45_p4, %p44_p3 }
   0xe   : > { %p157_p7 = scmp.eq.s32.totalorder %s682_s22, 1  ;;  %p163_p8 = scmp.eq.s32.totalorder %s426_s23, 1 }
   0xf   : > { %s893_s29 = scalar_select %p704_p6, 1, 0 }
  0x10   : > { %p460_p10 = scmp.lt.s32.totalorder %s626_s21, 2  ;;  %p711_p11 = por %p157_p7, %p38_p0 }
  0x11   : > { %p715_p12 = por %p163_p8, %p44_p3  ;;  %s720_s7 = sand.u32 1, %s622_s20  }
  0x12   : > { %s894_s30 = scalar_select %p711_p11, 1, 0 }
  0x13   : > { %s895_s6 = scalar_select %p715_p12, 1, 0 }
  0x14   : > { %s430_s8 = sshll.u32 %s626_s21, 6  ;;  %s429_s9 = sshll.u32 %s720_s7, 2 }
  0x15   : > { %s729_s12 = scalar_lea.hbm %s884_s0, %s430_s8  ;;  %s196_s13 = scalar_lea.vmem [#allocation2], %s429_s9 }
  0x16   : > { %s203_s14 = sshll.u32 %s196_s13, 4  ;;  %p735_p13 = pnand %p460_p10, %p700_p5  ;;  %s739_s14 = int_to_ptr.vmem [resolvable:$true] %s203_s14 }
  0x17   : > { %s193_s16 = scalar_lea.sflag [#allocation3], %s720_s7  ;;  %s496_s17 = scalar_lea.hbm %s729_s12, 64 }
  0x18   : > { %p497_p2 = scmp.ne.s32.totalorder %s729_s12, %s496_s17  ;;  %p498_p3 = pneg %p735_p13 }
  0x19   : > { %s501_s26 = scalar_lea.hbm %s884_s0, 128  ;;  %p502_p5 = scmp.lt.u32.totalorder %s729_s12, %s884_s0 }
  0x1a   : > { %p499_p4 = pnand %p498_p3, %p497_p2  ;;  %p503_p8 = scmp.lt.u32.totalorder %s501_s26, %s496_s17 }
  0x1b   : > { %p505_p9 = scmp.lt.u32.totalorder %s496_s17, %s729_s12 }
  0x1c   : > { %p500_p7 = pneg %p499_p4  ;;  %p504_p10 = por %p503_p8, %p502_p5 }
  0x1e   : > { %p506_p0 = por %p505_p9, %p504_p10 }
  0x20   : > { %p507_p1 = pnand %p506_p0, %p500_p7 }
  0x22   : > { %510 = shalt.err (!%p507_p1)
}
  0x23   : > { %s511_s11 = scalar_lea.vmem %s739_s14, 64  ;;  %s628_s13 = smov [#allocation2]  }
  0x24   : > { %p512_p2 = scmp.ne.s32.totalorder %s739_s14, %s511_s11  ;;  %s516_s23 = sshll.u32 %s628_s13, 4  ;;  %s517_s23 = int_to_ptr.vmem [resolvable:$false] %s516_s23 }
  0x25   : > { %s518_s25 = scalar_lea.vmem %s517_s23, 128  ;;  %p519_p11 = scmp.lt.s32.totalorder %s739_s14, %s517_s23 }
  0x26   : > { %p514_p4 = pnand %p512_p2, %p498_p3  ;;  %p520_p5 = scmp.lt.s32.totalorder %s518_s25, %s511_s11 }
  0x28   : > { %p515_p12 = pneg %p514_p4  ;;  %p521_p8 = por %p520_p5, %p519_p11 }
  0x2a   : > { %p522_p9 = pnand %p521_p8, %p515_p12 }
  0x2c   : > { %525 = shalt.err (!%p522_p9)
}
  0x2d   : > { %452 = dma.hbm_to_vmem [thread:$0]  (!%p735_p13), %s729_s12, 64, %s739_s14, %s193_s16  }
  0x2e   : > { %p897_p0 = scmp.lt.s32.totalorder %s626_s21, 3  ;;  %p898_p1 = scmp.ge.s32.totalorder %s626_s21, 1 }
  0x2f   : > { %s782_s10 = scalar_lea.hbm %s885_s1, %s430_s8  ;;  %s214_s11 = scalar_lea.vmem [#allocation5], %s429_s9 }
  0x30   : > { %p773_p7 = pnand %p898_p1, %p897_p0  ;;  %s221_s13 = sshll.u32 %s214_s11, 4  ;;  %s222_s13 = int_to_ptr.vmem [resolvable:$true] %s221_s13 }
  0x31   : > { %s211_s12 = scalar_lea.sflag [#allocation6], %s720_s7  ;;  %s526_s14 = scalar_lea.hbm %s782_s10, 64 }
  0x32   : > { %s899_s17 = scalar_select %p773_p7, 1, 0 }
  0x33   : > { %p527_p11 = scmp.ne.s32.totalorder %s782_s10, %s526_s14  ;;  %s531_s8 = scalar_lea.hbm %s885_s1, 128 }
  0x34   : > { %p532_p2 = scmp.lt.u32.totalorder %s782_s10, %s885_s1  ;;  %p533_p4 = scmp.lt.u32.totalorder %s531_s8, %s526_s14 }
  0x35   : > { %p529_p12 = pnand %p527_p11, %p498_p3  ;;  %p535_p8 = scmp.lt.u32.totalorder %s526_s14, %s782_s10 }
  0x36   : > { %p534_p5 = por %p533_p4, %p532_p2 }
  0x37   : > { %p530_p10 = pneg %p529_p12 }
  0x38   : > { %p536_p9 = por %p535_p8, %p534_p5 }
  0x3a   : > { %p537_p0 = pnand %p536_p9, %p530_p10 }
  0x3c   : > { %540 = shalt.err (!%p537_p0)
}
  0x3d   : > { %s541_s7 = scalar_lea.vmem %s222_s13, 64  ;;  %s629_s9 = smov [#allocation5]  }
  0x3e   : > { %p542_p1 = scmp.ne.s32.totalorder %s222_s13, %s541_s7  ;;  %s546_s28 = sshll.u32 %s629_s9, 4  ;;  %s547_s28 = int_to_ptr.vmem [resolvable:$false] %s546_s28 }
  0x3f   : > { %s548_s11 = scalar_lea.vmem %s547_s28, 128  ;;  %p549_p6 = scmp.lt.s32.totalorder %s222_s13, %s547_s28 }
  0x40   : > { %p544_p11 = pnand %p542_p1, %p498_p3  ;;  %p550_p7 = scmp.lt.s32.totalorder %s548_s11, %s541_s7 }
  0x42   : > { %p545_p12 = pneg %p544_p11  ;;  %p551_p2 = por %p550_p7, %p549_p6 }
  0x44   : > { %p552_p4 = pnand %p551_p2, %p545_p12 }
  0x46   : > { %555 = shalt.err (!%p552_p4)
}
  0x47   : > { %455 = dma.hbm_to_vmem [thread:$0]  (!%p735_p13), %s782_s10, 64, %s222_s13, %s211_s12  }
  0x48   : > { %p900_p10 = scmp.ne.s32.totalorder %s899_s17, 0 }
  0x49   : > { %s809_s14 = sand.u32 (!%p900_p10), 1, %s618_s19   ;;  %p901_p6 = scmp.ne.s32.totalorder (!%p900_p10), %s893_s29, 0 }
  0x4a   : > { %230 = sbr.rel (%p900_p10) target bundleno = 420 (0x1a4), region = 40  ;;  %s812_s16 = sshll.u32 (!%p900_p10), %s809_s14, 2 }
  0x4b   : > { %s233_s23 = scalar_lea.sflag (!%p900_p10), [#allocation3], %s809_s14  ;;  %s236_s8 = scalar_lea.vmem (!%p900_p10), [#allocation2], %s812_s16 }
  0x51   : > { %601 = dma.done.wait (%p901_p6), %s233_s23, 64  }
  0x52   : > { %603 = vsyncadd (%p901_p6), %s233_s23, 4294967232  ;;  %s242_s15 = scalar_lea.sflag [#allocation6], %s809_s14  ;;  %s245_s17 = scalar_lea.vmem [#allocation5], %s812_s16 }
  0x53   : > { %605 = dma.done.wait (%p901_p6), %s242_s15, 64  }
  0x54   : > { %607 = vsyncadd (%p901_p6), %s242_s15, 4294967232  ;;  %v277_v0 = vld [vmem:[%s236_s8] sm:$0xf]  ;;  %v279_v1 = vld [vmem:[%s245_s17] sm:$0xf]  ;;  %vm285_vm0 = vcmask 261120  }
  0x55   : > { %v282_v2 = vld [vmem:[%s886_s2] sm:$0xf]  ;;  %v278_v3 = vunpack.c.l.bf16 %v277_v0  ;;  %v280_v4 = vunpack.c.l.bf16 %v279_v1  ;;  %s440_s7 = sshll.u32 %s682_s22, 6  ;;  %s276_s9 = scalar_lea.vmem [#allocation7], %s812_s16  ;;  %vm317_vm1 = vcmask 257024  }
  0x56   : > { %v283_v5 = vunpack.c.l.bf16 %v282_v2  ;;  %v437_v18 = vld [vmem:[%s887_s3] ss:$0 sm:$0xff]  ;;  %s333_s28 = sshll.u32 %s276_s9, 4  ;;  %s840_s8 = scalar_lea.hbm %s889_s5, %s440_s7  ;;  %s842_s28 = int_to_ptr.vmem [resolvable:$true] %s333_s28 }
  0x57   : > { %v281_v6 = vadd.f32 %v280_v4, %v278_v3  ;;  %v438_v20 = vld [vmem:[%s888_s4] ss:$0 sm:$0xff]  ;;  %s320_s15 = scalar_lea.sflag [#allocation4], %s809_s14  ;;  %s556_s17 = scalar_lea.vmem %s842_s28, 64 }
  0x58   : > { %p557_p13 = scmp.ne.s32.totalorder %s842_s28, %s556_s17  ;;  %p902_p3 = scmp.ne.s32.totalorder %s894_s30, 0 }
  0x59   : > { %v284_v7 = vadd.f32 %v283_v5, %v281_v6  ;;  %s630_s22 = smov [#allocation7]  }
  0x5a   : > { %p558_p7 = pnand %p557_p13, %p902_p3  ;;  %s560_s16 = sshll.u32 %s630_s22, 4  ;;  %s561_s16 = int_to_ptr.vmem [resolvable:$false] %s560_s16 }
  0x5b   : > { %v286_v8 = vsel %vm285_vm0, %v284_v7, 0.0  ;;  %s562_s10 = scalar_lea.vmem %s561_s16, 128  ;;  %p563_p8 = scmp.lt.s32.totalorder %s842_s28, %s561_s16 }
  0x5c   : > { %287 = vadd.xlane.f32.xlu0 %v286_v8  ;;  %p559_p5 = pneg %p558_p7  ;;  %p564_p9 = scmp.lt.s32.totalorder %s562_s10, %s556_s17 }
  0x5e   : > { %p565_p0 = por %p564_p9, %p563_p8 }
  0x60   : > { %p566_p1 = pnand %p565_p0, %p559_p5 }
  0xe9   : > { %v288_v9 = vpop.xlane.xlu0 %287 }
  0xea   : > { %v290_v10 = vmul.f32 0.03125, %v288_v9 }
  0xec   : > { %v291_v11 = vsub.f32 %v284_v7, %v290_v10 }
  0xee   : > { %v292_v12 = vmul.f32 %v291_v11, %v291_v11 }
  0xf0   : > { %v293_v13 = vsel %vm285_vm0, %v292_v12, 0.0 }
  0xf1   : > { %294 = vadd.xlane.f32.xlu0 %v293_v13 }
 0x17e   : > { %v295_v14 = vpop.xlane.xlu0 %294 }
 0x17f   : > { %v296_v15 = vmul.f32 0.03125, %v295_v14 }
 0x181   : > { %v297_v16 = vadd.f32 1e-12, %v296_v15 }
 0x183   : > { %494 = vrsqrt.f32 %v297_v16 }
 0x18d   : > { %v495_v17 = vpop.eup %494 }
 0x18e   : > { %v299_v19 = vmul.f32 %v495_v17, %v291_v11 }
 0x190   : > { %v307_v21 = vmul.f32 %v437_v18, %v299_v19 }
 0x192   : > { %v315_v22 = vadd.f32 %v438_v20, %v307_v21 }
 0x194   : > { %v316_v23 = vpack.c.bf16 %v315_v22, %v315_v22 }
 0x196   : > { %318 = vst.msk [vmem:[%s276_s9] sm:$0xf] %vm317_vm1, %v316_v23 }
 0x197   : > { %569 = shalt.err (!%p566_p1)
}
 0x198   : > { %s570_s14 = scalar_lea.hbm %s840_s8, 64  ;;  %s574_s12 = scalar_lea.hbm %s889_s5, 128 }
 0x199   : > { %p571_p11 = scmp.ne.s32.totalorder %s840_s8, %s570_s14  ;;  %p575_p4 = scmp.lt.u32.totalorder %s840_s8, %s889_s5 }
 0x19a   : > { %p576_p10 = scmp.lt.u32.totalorder %s574_s12, %s570_s14  ;;  %p578_p13 = scmp.lt.u32.totalorder %s570_s14, %s840_s8 }
 0x19b   : > { %p572_p12 = pnand %p571_p11, %p902_p3 }
 0x19c   : > { %p577_p6 = por %p576_p10, %p575_p4 }
 0x19d   : > { %p573_p2 = pneg %p572_p12 }
 0x19e   : > { %p579_p7 = por %p578_p13, %p577_p6 }
 0x1a0   : > { %p580_p5 = pnand %p579_p7, %p573_p2 }
 0x1a2   : > { %583 = shalt.err (!%p580_p5)
}
 0x1a3   : > { %447 = dma.vmem_to_hbm [thread:$0]  (%p902_p3), %s842_s28, 64, %s840_s8, %s320_s15  }
 0x1a4 PF: > { %s345_s7 = sand.u32 1, %s614_s18   ;;  %p903_p8 = scmp.ne.s32.totalorder %s895_s6, 0 }
 0x1a5   : > { %p904_p9 = scmp.ge.s32.totalorder %s626_s21, 2  ;;  %s346_s9 = scalar_lea.sflag [#allocation4], %s345_s7 }
 0x1a7   : > { %p457_p0 = pnand %p904_p9, %p903_p8 }
 0x1a9   : > { %609 = dma.done.wait (!%p457_p0), %s346_s9, 64  }
 0x1aa   : > { %611 = vsyncadd (!%p457_p0), %s346_s9, 4294967232  ;;  %p21_p1 = scmp.ge.s32.totalorder %s686_s24, 4   ;;  %s905_s18 = smov %s618_s19 }
 0x1ab   : > { %s906_s19 = smov %s622_s20  ;;  %s907_s20 = smov %s698_s27 }
 0x1ac   : > { %s908_s21 = smov %s686_s24  ;;  %23 = sbr.rel (!%p21_p1) target bundleno = 7 (0x7), region = 98 }
 0x1b3   :  { %351 = vsyncpa [#allocation3], 1 }
 0x1b4   :  { %353 = vsyncpa [#allocation3 + $0x1], 1 }
 0x1b5   :  { %354 = vsyncpa [#allocation6], 1 }
 0x1b6   :  { %356 = vsyncpa [#allocation6 + $0x1], 1 }
 0x1b7   :  { %357 = vsyncpa [#allocation4], 1 }
 0x1b8   :  { %359 = vsyncpa [#allocation4 + $0x1], 1 }

</bundles_post_ra>
